<compile_context>
chip_gen: v7x
topology: tpu7x:2x2x1
jax: 0.10.0
libtpu: 0.0.40
codegen_flags: <defaults>
</compile_context>

<pallas_src>
import functools

import jax
import jax.numpy as jnp
from jax import lax
from jax.experimental import pallas as pl
from jax.experimental.pallas import tpu as pltpu

N_PAD = 128  # lane-dense padding of the final Linear's output dimension


# ------------------------------ fused kernel ------------------------------ #

def _fused_atari_pgn_kernel(lhs1_ref, w1_ref, b1_ref, w2_ref, b2_ref,
                            w3_ref, b3_ref, wf1_ref, bf1_ref,
                            wf2_ref, bf2_ref, out_ref, *, batch, m_fc):
    f32 = jnp.float32
    bf16 = jnp.bfloat16
    B = batch

    # ---- conv1: one matmul [64B, 256] x [256, 32], K folded over taps ----
    a1 = jnp.dot(lhs1_ref[...], w1_ref[...], preferred_element_type=f32)
    a1 = jnp.maximum(a1 + b1_ref[...], 0.0)              # [64B, 32] f32
    # rows ordered (rh, rw, oh2, ow2, b); conv1 spatial = (2*oh2+rh, 2*ow2+rw)

    # Pad rows so the "extended window" slices below stay in bounds
    # (max slice end is 69B; pad to 72B).
    a1p = jnp.concatenate([a1, jnp.zeros((8 * B, 32), f32)], axis=0)

    # ---- conv2: 16 contiguous row-slices folded along K -> one matmul ----
    # Extended output grid (Y, X) in 0..3; only Y,X <= 2 are valid, the extra
    # rows hold garbage and are never read again (discarded by conv3 below).
    taps2 = []
    for i in range(4):                                   # conv2 kernel row
        qi, ri = i // 2, i % 2
        for j in range(4):                               # conv2 kernel col
            qj, rj = j // 2, j % 2
            start = ((ri * 2 + rj) * 16 + qi * 4 + qj) * B
            taps2.append(a1p[start:start + 16 * B, :])   # [16B, 32]
    lhs2 = jnp.concatenate(taps2, axis=-1).astype(bf16)  # [16B, 512]
    a2 = jnp.dot(lhs2, w2_ref[...], preferred_element_type=f32)
    a2 = jnp.maximum(a2 + b2_ref[...], 0.0)              # [16B, 64]; rows (Y,X,b)

    # ---- conv3 (covers the full 3x3 extent) as one matmul ----
    pieces = [a2[(y * 4 + x) * B:(y * 4 + x) * B + B, :]
              for y in range(3) for x in range(3)]       # valid rows only
    lhs3 = jnp.concatenate(pieces, axis=-1)              # [B, 576] f32
    if m_fc > B:  # sublane-align the FC stage and the final store
        lhs3 = jnp.concatenate(
            [lhs3, jnp.zeros((m_fc - B, 576), f32)], axis=0)
    a3 = jnp.dot(lhs3.astype(bf16), w3_ref[...], preferred_element_type=f32)
    a3 = jnp.maximum(a3 + b3_ref[...], 0.0)              # [m_fc, 64]

    # ---- FC1 + ReLU ----
    h = jnp.dot(a3.astype(bf16), wf1_ref[...], preferred_element_type=f32)
    h = jnp.maximum(h + bf1_ref[...], 0.0)               # [m_fc, 512]

    # ---- FC2 (lane-padded to 128 outputs; lane+sublane dense store) ----
    o = jnp.dot(h.astype(bf16), wf2_ref[...], preferred_element_type=f32)
    out_ref[...] = (o + bf2_ref[...]).astype(out_ref.dtype)


# --------------------------------- wrapper -------------------------------- #

def atari_pgn_forward(params, x, n_actions):
    """Fused forward pass. x: [B, C, 36, 36] NCHW f32 -> [B, n_actions]."""
    B, C, H, W = x.shape
    assert H == 36 and W == 36, "fused kernel specialised to 36x36 frames"
    assert params["w1"].shape == (32, C, 8, 8)
    bf16 = jnp.bfloat16
    f32 = jnp.float32
    CH = 16 * C                      # channels after space-to-depth by 4
    m_fc = max(8, ((B + 7) // 8) * 8)

    # Bijective space-to-depth (stride-4 blocking), channel order (u, v, c),
    # then fold the 4 conv1 taps along K (total lhs ~64 KB at B=2 -- layout
    # plumbing, negligible next to the ~350 KB of weights).
    g = (x.reshape(B, C, 9, 4, 9, 4)
           .transpose(0, 2, 4, 3, 5, 1)
           .reshape(B, 9, 9, CH))
    taps = []
    for ti in range(2):
        for tj in range(2):
            t = g[:, ti:ti + 8, tj:tj + 8, :]            # [B, 8, 8, CH]
            t = t.reshape(B, 4, 2, 4, 2, CH)             # (b, oh2, rh, ow2, rw, ch)
            t = t.transpose(2, 4, 1, 3, 0, 5)            # (rh, rw, oh2, ow2, b, ch)
            taps.append(t.reshape(64 * B, CH))
    lhs1 = jnp.concatenate(taps, axis=-1).astype(bf16)   # [64B, 4*CH]

    # Weights, packed to match the in-kernel K orderings, cast to bf16 once.
    w1 = (params["w1"].reshape(32, C, 2, 4, 2, 4)
                      .transpose(2, 4, 3, 5, 1, 0)       # (ti, tj, u, v, c, o)
                      .reshape(4 * CH, 32)).astype(bf16)
    w2 = params["w2"].transpose(2, 3, 1, 0).reshape(512, 64).astype(bf16)
    w3 = params["w3"].transpose(2, 3, 1, 0).reshape(576, 64).astype(bf16)
    wf1 = params["wf1"].astype(bf16)                     # [64, 512]
    wf2 = jnp.pad(params["wf2"], ((0, 0), (0, N_PAD - n_actions))).astype(bf16)

    b1 = params["b1"].reshape(1, 32).astype(f32)
    b2 = params["b2"].reshape(1, 64).astype(f32)
    b3 = params["b3"].reshape(1, 64).astype(f32)
    bf1 = params["bf1"].reshape(1, 512).astype(f32)
    bf2 = jnp.pad(params["bf2"], (0, N_PAD - n_actions)).reshape(1, N_PAD)
    bf2 = bf2.astype(f32)

    operands = (lhs1, w1, b1, w2, b2, w3, b3, wf1, bf1, wf2, bf2)

    flops = 2 * (64 * B * (4 * CH) * 32       # conv1
                 + 16 * B * 512 * 64          # conv2 (extended grid)
                 + m_fc * 576 * 64            # conv3
                 + m_fc * 64 * 512            # fc1
                 + m_fc * 512 * N_PAD)        # fc2 (padded)
    bytes_accessed = sum(int(a.size) * a.dtype.itemsize for a in operands) \
        + m_fc * N_PAD * 4

    def full(shape):
        return pl.BlockSpec(shape, lambda i, _n=len(shape): (0,) * _n)

    kernel = functools.partial(_fused_atari_pgn_kernel, batch=B, m_fc=m_fc)
    out = pl.pallas_call(
        kernel,
        out_shape=jax.ShapeDtypeStruct((m_fc, N_PAD), jnp.float32),
        grid=(1,),  # whole net fits in VMEM at this batch; tile rows for big B
        in_specs=[full(a.shape) for a in operands],
        out_specs=full((m_fc, N_PAD)),
        compiler_params=pltpu.CompilerParams(
            dimension_semantics=("arbitrary",)),
        cost_estimate=pl.CostEstimate(flops=flops, transcendentals=0,
                                      bytes_accessed=bytes_accessed),
    )(*operands)
    return out[:B, :n_actions]


# ------------------------------ params / ref ------------------------------ #

def init_params(key, in_channels, n_actions, conv_out_size):
    ks = jax.random.split(key, 10)

    def lin(kw_, kb_, fan_in, shape_w, shape_b):
        s = 1.0 / jnp.sqrt(fan_in)
        return (jax.random.uniform(kw_, shape_w, jnp.float32, -s, s),
                jax.random.uniform(kb_, shape_b, jnp.float32, -s, s))

    w1, b1 = lin(ks[0], ks[1], in_channels * 8 * 8, (32, in_channels, 8, 8), (32,))
    w2, b2 = lin(ks[2], ks[3], 32 * 4 * 4, (64, 32, 4, 4), (64,))
    w3, b3 = lin(ks[4], ks[5], 64 * 3 * 3, (64, 64, 3, 3), (64,))
    wf1, bf1 = lin(ks[6], ks[7], conv_out_size, (conv_out_size, 512), (512,))
    wf2, bf2 = lin(ks[8], ks[9], 512, (512, n_actions), (n_actions,))
    return dict(w1=w1, b1=b1, w2=w2, b2=b2, w3=w3, b3=b3,
                wf1=wf1, bf1=bf1, wf2=wf2, bf2=bf2)


def reference_forward(params, x):
    """Pure-JAX (XLA conv, f32) reference reproducing PyTorch semantics."""
    def conv(x, w, b, s):
        y = lax.conv_general_dilated(
            x, w, (s, s), "VALID", dimension_numbers=("NCHW", "OIHW", "NCHW"))
        return jnp.maximum(y + b[None, :, None, None], 0.0)

    h = conv(x, params["w1"], params["b1"], 4)
    h = conv(h, params["w2"], params["b2"], 2)
    h = conv(h, params["w3"], params["b3"], 1)
    flat = h.reshape(x.shape[0], -1)
    h = jnp.maximum(flat @ params["wf1"] + params["bf1"], 0.0)
    return h @ params["wf2"] + params["bf2"]


if __name__ == "__main__":
    # Small Atari-like shapes: batch=2, 4 stacked frames, 36x36 spatial.
    # Conv spatial: 36 -> 8 -> 3 -> 1  =>  conv_out_size = 64.
    B, C, H, W = 2, 4, 36, 36
    N_ACTIONS = 6
    CONV_OUT = 64

    key = jax.random.PRNGKey(0)
    kx, kp = jax.random.split(key)
    x = jax.random.normal(kx, (B, C, H, W), jnp.float32)
    params = init_params(kp, C, N_ACTIONS, CONV_OUT)

    fwd = jax.jit(lambda p, xx: atari_pgn_forward(p, xx, N_ACTIONS))
    out = jax.block_until_ready(fwd(params, x))

    ref = jax.block_until_ready(reference_forward(params, x))
    assert out.shape == (B, N_ACTIONS), out.shape
    # bf16 MXU operands with f32 accumulation -> slightly relaxed tolerance.
    assert jnp.allclose(out, ref, rtol=3e-2, atol=3e-2), (out, ref)

    print("KERNEL_OK")
</pallas_src>

<mosaic_0001>
module attributes {stable_mosaic.version = 11 : i64} {
  func.func @_fused_atari_pgn_kernel(%arg0: i32, %arg1: memref<128x256xbf16, #tpu.memory_space<vmem>>, %arg2: memref<256x32xbf16, #tpu.memory_space<vmem>>, %arg3: memref<1x32xf32, #tpu.memory_space<vmem>>, %arg4: memref<512x64xbf16, #tpu.memory_space<vmem>>, %arg5: memref<1x64xf32, #tpu.memory_space<vmem>>, %arg6: memref<576x64xbf16, #tpu.memory_space<vmem>>, %arg7: memref<1x64xf32, #tpu.memory_space<vmem>>, %arg8: memref<64x512xbf16, #tpu.memory_space<vmem>>, %arg9: memref<1x512xf32, #tpu.memory_space<vmem>>, %arg10: memref<512x128xbf16, #tpu.memory_space<vmem>>, %arg11: memref<1x128xf32, #tpu.memory_space<vmem>>, %arg12: memref<8x128xf32, #tpu.memory_space<vmem>>) attributes {dimension_semantics = [#tpu.dimension_semantics<arbitrary>], iteration_bounds = array<i64: 1>, scalar_prefetch = 0 : i64, scratch_operands = 0 : i64, tpu.core_type = #tpu.core_type<tc>, window_params = [{pipeline_mode = #tpu.pipeline_mode<synchronous>, transform_indices = @transform_0, window_bounds = array<i64: 128, 256>}, {pipeline_mode = #tpu.pipeline_mode<synchronous>, transform_indices = @transform_1, window_bounds = array<i64: 256, 32>}, {pipeline_mode = #tpu.pipeline_mode<synchronous>, transform_indices = @transform_2, window_bounds = array<i64: 1, 32>}, {pipeline_mode = #tpu.pipeline_mode<synchronous>, transform_indices = @transform_3, window_bounds = array<i64: 512, 64>}, {pipeline_mode = #tpu.pipeline_mode<synchronous>, transform_indices = @transform_4, window_bounds = array<i64: 1, 64>}, {pipeline_mode = #tpu.pipeline_mode<synchronous>, transform_indices = @transform_5, window_bounds = array<i64: 576, 64>}, {pipeline_mode = #tpu.pipeline_mode<synchronous>, transform_indices = @transform_6, window_bounds = array<i64: 1, 64>}, {pipeline_mode = #tpu.pipeline_mode<synchronous>, transform_indices = @transform_7, window_bounds = array<i64: 64, 512>}, {pipeline_mode = #tpu.pipeline_mode<synchronous>, transform_indices = @transform_8, window_bounds = array<i64: 1, 512>}, {pipeline_mode = #tpu.pipeline_mode<synchronous>, transform_indices = @transform_9, window_bounds = array<i64: 512, 128>}, {pipeline_mode = #tpu.pipeline_mode<synchronous>, transform_indices = @transform_10, window_bounds = array<i64: 1, 128>}, {pipeline_mode = #tpu.pipeline_mode<synchronous>, transform_indices = @transform_11, window_bounds = array<i64: 8, 128>}]} {
    %c0 = arith.constant 0 : index
    %c0_0 = arith.constant 0 : index
    %0 = vector.load %arg1[%c0, %c0_0] : memref<128x256xbf16, #tpu.memory_space<vmem>>, vector<128x256xbf16>
    %c0_1 = arith.constant 0 : index
    %c0_2 = arith.constant 0 : index
    %1 = vector.load %arg2[%c0_1, %c0_2] : memref<256x32xbf16, #tpu.memory_space<vmem>>, vector<256x32xbf16>
    %cst = arith.constant dense<0.000000e+00> : vector<128x32xf32>
    %2 = tpu.matmul %0, %1, %cst {dimension_numbers = #tpu.dot_dimension_numbers<[1], [0], [0], [1], [0, 0, 1, 1], [], []>} : vector<128x256xbf16>, vector<256x32xbf16>, vector<128x32xf32> -> vector<128x32xf32>
    %c0_3 = arith.constant 0 : index
    %c0_4 = arith.constant 0 : index
    %3 = vector.load %arg3[%c0_3, %c0_4] : memref<1x32xf32, #tpu.memory_space<vmem>>, vector<1x32xf32>
    %4 = vector.broadcast %3 : vector<1x32xf32> to vector<128x32xf32>
    %5 = arith.addf %2, %4 : vector<128x32xf32>
    %cst_5 = arith.constant 0.000000e+00 : f32
    %6 = vector.broadcast %cst_5 : f32 to vector<128x32xf32>
    %7 = arith.maximumf %5, %6 : vector<128x32xf32>
    %cst_6 = arith.constant 0.000000e+00 : f32
    %8 = vector.broadcast %cst_6 : f32 to vector<16x32xf32>
    %9 = tpu.concatenate %7, %8 in 0 : vector<128x32xf32>, vector<16x32xf32> -> vector<144x32xf32>
    %10 = vector.extract_strided_slice %9 {offsets = [0, 0], sizes = [32, 32], strides = [1, 1]} : vector<144x32xf32> to vector<32x32xf32>
    %11 = vector.extract_strided_slice %9 {offsets = [32, 0], sizes = [32, 32], strides = [1, 1]} : vector<144x32xf32> to vector<32x32xf32>
    %12 = vector.extract_strided_slice %9 {offsets = [2, 0], sizes = [32, 32], strides = [1, 1]} : vector<144x32xf32> to vector<32x32xf32>
    %13 = vector.extract_strided_slice %9 {offsets = [34, 0], sizes = [32, 32], strides = [1, 1]} : vector<144x32xf32> to vector<32x32xf32>
    %14 = vector.extract_strided_slice %9 {offsets = [64, 0], sizes = [32, 32], strides = [1, 1]} : vector<144x32xf32> to vector<32x32xf32>
    %15 = vector.extract_strided_slice %9 {offsets = [96, 0], sizes = [32, 32], strides = [1, 1]} : vector<144x32xf32> to vector<32x32xf32>
    %16 = vector.extract_strided_slice %9 {offsets = [66, 0], sizes = [32, 32], strides = [1, 1]} : vector<144x32xf32> to vector<32x32xf32>
    %17 = vector.extract_strided_slice %9 {offsets = [98, 0], sizes = [32, 32], strides = [1, 1]} : vector<144x32xf32> to vector<32x32xf32>
    %18 = vector.extract_strided_slice %9 {offsets = [8, 0], sizes = [32, 32], strides = [1, 1]} : vector<144x32xf32> to vector<32x32xf32>
    %19 = vector.extract_strided_slice %9 {offsets = [40, 0], sizes = [32, 32], strides = [1, 1]} : vector<144x32xf32> to vector<32x32xf32>
    %20 = vector.extract_strided_slice %9 {offsets = [10, 0], sizes = [32, 32], strides = [1, 1]} : vector<144x32xf32> to vector<32x32xf32>
    %21 = vector.extract_strided_slice %9 {offsets = [42, 0], sizes = [32, 32], strides = [1, 1]} : vector<144x32xf32> to vector<32x32xf32>
    %22 = vector.extract_strided_slice %9 {offsets = [72, 0], sizes = [32, 32], strides = [1, 1]} : vector<144x32xf32> to vector<32x32xf32>
    %23 = vector.extract_strided_slice %9 {offsets = [104, 0], sizes = [32, 32], strides = [1, 1]} : vector<144x32xf32> to vector<32x32xf32>
    %24 = vector.extract_strided_slice %9 {offsets = [74, 0], sizes = [32, 32], strides = [1, 1]} : vector<144x32xf32> to vector<32x32xf32>
    %25 = vector.extract_strided_slice %9 {offsets = [106, 0], sizes = [32, 32], strides = [1, 1]} : vector<144x32xf32> to vector<32x32xf32>
    %26 = tpu.concatenate %10, %11, %12, %13, %14, %15, %16, %17, %18, %19, %20, %21, %22, %23, %24, %25 in 1 : vector<32x32xf32>, vector<32x32xf32>, vector<32x32xf32>, vector<32x32xf32>, vector<32x32xf32>, vector<32x32xf32>, vector<32x32xf32>, vector<32x32xf32>, vector<32x32xf32>, vector<32x32xf32>, vector<32x32xf32>, vector<32x32xf32>, vector<32x32xf32>, vector<32x32xf32>, vector<32x32xf32>, vector<32x32xf32> -> vector<32x512xf32>
    %27 = arith.truncf %26 : vector<32x512xf32> to vector<32x512xbf16>
    %c0_7 = arith.constant 0 : index
    %c0_8 = arith.constant 0 : index
    %28 = vector.load %arg4[%c0_7, %c0_8] : memref<512x64xbf16, #tpu.memory_space<vmem>>, vector<512x64xbf16>
    %cst_9 = arith.constant dense<0.000000e+00> : vector<32x64xf32>
    %29 = tpu.matmul %27, %28, %cst_9 {dimension_numbers = #tpu.dot_dimension_numbers<[1], [0], [0], [1], [0, 0, 1, 1], [], []>} : vector<32x512xbf16>, vector<512x64xbf16>, vector<32x64xf32> -> vector<32x64xf32>
    %c0_10 = arith.constant 0 : index
    %c0_11 = arith.constant 0 : index
    %30 = vector.load %arg5[%c0_10, %c0_11] : memref<1x64xf32, #tpu.memory_space<vmem>>, vector<1x64xf32>
    %31 = vector.broadcast %30 : vector<1x64xf32> to vector<32x64xf32>
    %32 = arith.addf %29, %31 : vector<32x64xf32>
    %cst_12 = arith.constant 0.000000e+00 : f32
    %33 = vector.broadcast %cst_12 : f32 to vector<32x64xf32>
    %34 = arith.maximumf %32, %33 : vector<32x64xf32>
    %35 = vector.extract_strided_slice %34 {offsets = [0, 0], sizes = [2, 64], strides = [1, 1]} : vector<32x64xf32> to vector<2x64xf32>
    %36 = vector.extract_strided_slice %34 {offsets = [2, 0], sizes = [2, 64], strides = [1, 1]} : vector<32x64xf32> to vector<2x64xf32>
    %37 = vector.extract_strided_slice %34 {offsets = [4, 0], sizes = [2, 64], strides = [1, 1]} : vector<32x64xf32> to vector<2x64xf32>
    %38 = vector.extract_strided_slice %34 {offsets = [8, 0], sizes = [2, 64], strides = [1, 1]} : vector<32x64xf32> to vector<2x64xf32>
    %39 = vector.extract_strided_slice %34 {offsets = [10, 0], sizes = [2, 64], strides = [1, 1]} : vector<32x64xf32> to vector<2x64xf32>
    %40 = vector.extract_strided_slice %34 {offsets = [12, 0], sizes = [2, 64], strides = [1, 1]} : vector<32x64xf32> to vector<2x64xf32>
    %41 = vector.extract_strided_slice %34 {offsets = [16, 0], sizes = [2, 64], strides = [1, 1]} : vector<32x64xf32> to vector<2x64xf32>
    %42 = vector.extract_strided_slice %34 {offsets = [18, 0], sizes = [2, 64], strides = [1, 1]} : vector<32x64xf32> to vector<2x64xf32>
    %43 = vector.extract_strided_slice %34 {offsets = [20, 0], sizes = [2, 64], strides = [1, 1]} : vector<32x64xf32> to vector<2x64xf32>
    %44 = tpu.concatenate %35, %36, %37, %38, %39, %40, %41, %42, %43 in 1 : vector<2x64xf32>, vector<2x64xf32>, vector<2x64xf32>, vector<2x64xf32>, vector<2x64xf32>, vector<2x64xf32>, vector<2x64xf32>, vector<2x64xf32>, vector<2x64xf32> -> vector<2x576xf32>
    %cst_13 = arith.constant 0.000000e+00 : f32
    %45 = vector.broadcast %cst_13 : f32 to vector<6x576xf32>
    %46 = tpu.concatenate %44, %45 in 0 : vector<2x576xf32>, vector<6x576xf32> -> vector<8x576xf32>
    %47 = arith.truncf %46 : vector<8x576xf32> to vector<8x576xbf16>
    %c0_14 = arith.constant 0 : index
    %c0_15 = arith.constant 0 : index
    %48 = vector.load %arg6[%c0_14, %c0_15] : memref<576x64xbf16, #tpu.memory_space<vmem>>, vector<576x64xbf16>
    %cst_16 = arith.constant dense<0.000000e+00> : vector<8x64xf32>
    %49 = tpu.matmul %47, %48, %cst_16 {dimension_numbers = #tpu.dot_dimension_numbers<[1], [0], [0], [1], [0, 0, 1, 1], [], []>} : vector<8x576xbf16>, vector<576x64xbf16>, vector<8x64xf32> -> vector<8x64xf32>
    %c0_17 = arith.constant 0 : index
    %c0_18 = arith.constant 0 : index
    %50 = vector.load %arg7[%c0_17, %c0_18] : memref<1x64xf32, #tpu.memory_space<vmem>>, vector<1x64xf32>
    %51 = vector.broadcast %50 : vector<1x64xf32> to vector<8x64xf32>
    %52 = arith.addf %49, %51 : vector<8x64xf32>
    %cst_19 = arith.constant 0.000000e+00 : f32
    %53 = vector.broadcast %cst_19 : f32 to vector<8x64xf32>
    %54 = arith.maximumf %52, %53 : vector<8x64xf32>
    %55 = arith.truncf %54 : vector<8x64xf32> to vector<8x64xbf16>
    %c0_20 = arith.constant 0 : index
    %c0_21 = arith.constant 0 : index
    %56 = vector.load %arg8[%c0_20, %c0_21] : memref<64x512xbf16, #tpu.memory_space<vmem>>, vector<64x512xbf16>
    %cst_22 = arith.constant dense<0.000000e+00> : vector<8x512xf32>
    %57 = tpu.matmul %55, %56, %cst_22 {dimension_numbers = #tpu.dot_dimension_numbers<[1], [0], [0], [1], [0, 0, 1, 1], [], []>} : vector<8x64xbf16>, vector<64x512xbf16>, vector<8x512xf32> -> vector<8x512xf32>
    %c0_23 = arith.constant 0 : index
    %c0_24 = arith.constant 0 : index
    %58 = vector.load %arg9[%c0_23, %c0_24] : memref<1x512xf32, #tpu.memory_space<vmem>>, vector<1x512xf32>
    %59 = vector.broadcast %58 : vector<1x512xf32> to vector<8x512xf32>
    %60 = arith.addf %57, %59 : vector<8x512xf32>
    %cst_25 = arith.constant 0.000000e+00 : f32
    %61 = vector.broadcast %cst_25 : f32 to vector<8x512xf32>
    %62 = arith.maximumf %60, %61 : vector<8x512xf32>
    %63 = arith.truncf %62 : vector<8x512xf32> to vector<8x512xbf16>
    %c0_26 = arith.constant 0 : index
    %c0_27 = arith.constant 0 : index
    %64 = vector.load %arg10[%c0_26, %c0_27] : memref<512x128xbf16, #tpu.memory_space<vmem>>, vector<512x128xbf16>
    %cst_28 = arith.constant dense<0.000000e+00> : vector<8x128xf32>
    %65 = tpu.matmul %63, %64, %cst_28 {dimension_numbers = #tpu.dot_dimension_numbers<[1], [0], [0], [1], [0, 0, 1, 1], [], []>} : vector<8x512xbf16>, vector<512x128xbf16>, vector<8x128xf32> -> vector<8x128xf32>
    %c0_29 = arith.constant 0 : index
    %c0_30 = arith.constant 0 : index
    %66 = vector.load %arg11[%c0_29, %c0_30] : memref<1x128xf32, #tpu.memory_space<vmem>>, vector<1x128xf32>
    %67 = vector.broadcast %66 : vector<1x128xf32> to vector<8x128xf32>
    %68 = arith.addf %65, %67 : vector<8x128xf32>
    %c0_31 = arith.constant 0 : index
    %c0_32 = arith.constant 0 : index
    %69 = vector.load %arg12[%c0_31, %c0_32] : memref<8x128xf32, #tpu.memory_space<vmem>>, vector<8x128xf32>
    tpu.vector_store %arg12[%c0_31, %c0_32], %68 {strides = array<i32>} : memref<8x128xf32, #tpu.memory_space<vmem>>, vector<8x128xf32>,
    return
  }
  func.func @transform_0(%arg0: i32) -> (i32, i32) {
    %c0_i32 = arith.constant 0 : i32
    %c0_i32_0 = arith.constant 0 : i32
    %c0_i32_1 = arith.constant 0 : i32
    return %c0_i32, %c0_i32_0 : i32, i32
  }
  func.func @transform_1(%arg0: i32) -> (i32, i32) {
    %c0_i32 = arith.constant 0 : i32
    %c0_i32_0 = arith.constant 0 : i32
    %c0_i32_1 = arith.constant 0 : i32
    return %c0_i32, %c0_i32_0 : i32, i32
  }
  func.func @transform_2(%arg0: i32) -> (i32, i32) {
    %c0_i32 = arith.constant 0 : i32
    %c0_i32_0 = arith.constant 0 : i32
    %c0_i32_1 = arith.constant 0 : i32
    return %c0_i32, %c0_i32_0 : i32, i32
  }
  func.func @transform_3(%arg0: i32) -> (i32, i32) {
    %c0_i32 = arith.constant 0 : i32
    %c0_i32_0 = arith.constant 0 : i32
    %c0_i32_1 = arith.constant 0 : i32
    return %c0_i32, %c0_i32_0 : i32, i32
  }
  func.func @transform_4(%arg0: i32) -> (i32, i32) {
    %c0_i32 = arith.constant 0 : i32
    %c0_i32_0 = arith.constant 0 : i32
    %c0_i32_1 = arith.constant 0 : i32
    return %c0_i32, %c0_i32_0 : i32, i32
  }
  func.func @transform_5(%arg0: i32) -> (i32, i32) {
    %c0_i32 = arith.constant 0 : i32
    %c0_i32_0 = arith.constant 0 : i32
    %c0_i32_1 = arith.constant 0 : i32
    return %c0_i32, %c0_i32_0 : i32, i32
  }
  func.func @transform_6(%arg0: i32) -> (i32, i32) {
    %c0_i32 = arith.constant 0 : i32
    %c0_i32_0 = arith.constant 0 : i32
    %c0_i32_1 = arith.constant 0 : i32
    return %c0_i32, %c0_i32_0 : i32, i32
  }
  func.func @transform_7(%arg0: i32) -> (i32, i32) {
    %c0_i32 = arith.constant 0 : i32
    %c0_i32_0 = arith.constant 0 : i32
    %c0_i32_1 = arith.constant 0 : i32
    return %c0_i32, %c0_i32_0 : i32, i32
  }
  func.func @transform_8(%arg0: i32) -> (i32, i32) {
    %c0_i32 = arith.constant 0 : i32
    %c0_i32_0 = arith.constant 0 : i32
    %c0_i32_1 = arith.constant 0 : i32
    return %c0_i32, %c0_i32_0 : i32, i32
  }
  func.func @transform_9(%arg0: i32) -> (i32, i32) {
    %c0_i32 = arith.constant 0 : i32
    %c0_i32_0 = arith.constant 0 : i32
    %c0_i32_1 = arith.constant 0 : i32
    return %c0_i32, %c0_i32_0 : i32, i32
  }
  func.func @transform_10(%arg0: i32) -> (i32, i32) {
    %c0_i32 = arith.constant 0 : i32
    %c0_i32_0 = arith.constant 0 : i32
    %c0_i32_1 = arith.constant 0 : i32
    return %c0_i32, %c0_i32_0 : i32, i32
  }
  func.func @transform_11(%arg0: i32) -> (i32, i32) {
    %c0_i32 = arith.constant 0 : i32
    %c0_i32_0 = arith.constant 0 : i32
    %c0_i32_1 = arith.constant 0 : i32
    return %c0_i32, %c0_i32_0 : i32, i32
  }
}

</mosaic_0001>

<bundles_post_ra>
// kernel: _lambda_.1
= control target key start
LH: loop header
LB: loop body
LE: loop exit
PB: predicated region body
PF: predicated region fallthrough
CT: control target
= control target key end

     0   :  { %vm403_vm0 = vcmask 1045504   ;;  %s2593_s26 = smov 64   ;;  %s2594_s16 = smov 32   ;;  %vm525_vm1 = vcmask 261120   ;;  %vm530_vm2 = vcmask 523264   ;;  %vm535_vm3 = vcmask 785408   ;;  %s3334_s1 = inlined_call_operand.vmem [shape: bf16[256,32], index: 1, kind: input, shape index: {}]   ;;  %s3335_s0 = inlined_call_operand.vmem [shape: bf16[128,256], index: 0, kind: input, shape index: {}]   ;;  %s3336_s2 = inlined_call_operand.vmem [shape: f32[1,32], index: 2, kind: input, shape index: {}]   ;;  %s3337_s3 = inlined_call_operand.vmem [shape: bf16[512,64], index: 3, kind: input, shape index: {}]   ;;  %s3338_s5 = inlined_call_operand.vmem [shape: bf16[576,64], index: 5, kind: input, shape index: {}]   ;;  %s3339_s4 = inlined_call_operand.vmem [shape: f32[1,64], index: 4, kind: input, shape index: {}]   ;;  %s3340_s7 = inlined_call_operand.vmem [shape: bf16[64,512], index: 7, kind: input, shape index: {}]   ;;  %s3341_s9 = inlined_call_operand.vmem [shape: bf16[512,128], index: 9, kind: input, shape index: {}]   ;;  %s3342_s6 = inlined_call_operand.vmem [shape: f32[1,64], index: 6, kind: input, shape index: {}]   ;;  %s3343_s8 = inlined_call_operand.vmem [shape: f32[1,512], index: 8, kind: input, shape index: {}]   ;;  %s3344_s10 = inlined_call_operand.vmem [shape: f32[1,128], index: 10, kind: input, shape index: {}]   ;;  %s3345_s11 = inlined_call_operand.vmem [shape: f32[8,128], index: 11, kind: output, shape index: {}]  }
   0x1   :  { %v2429_v0 = vld [vmem:[%s3334_s1 + $0x40] sm:$0xff]   ;;  %v2431_v2 = vld [vmem:[%s3334_s1 + $0x48] sm:$0xff]   ;;  %v2433_v4 = vld [vmem:[%s3334_s1 + $0x50] sm:$0xff]   ;;  %s2595_s17 = smov 96   ;;  %vm956_vm4 = vcmask 1041408   ;;  %vm2597_vm6 = vmmov 0  }
   0x2   :  { %v2430_v1 = vld [vmem:[%s3334_s1] sm:$0xff]   ;;  %2113 = vmatprep.subr.bf16.mxu0 %v2429_v0  ;;  %v2432_v3 = vld [vmem:[%s3334_s1 + $0x8] sm:$0xff]   ;;  %v2434_v5 = vld [vmem:[%s3334_s1 + $0x10] sm:$0xff]  }
   0x3   :  { %2114 = vmatpush3.bf16.msra.mxu0 %v2430_v1  ;;  %v2435_v6 = vld [vmem:[%s3334_s1 + $0x58] sm:$0xff]   ;;  %v2437_v8 = vld [vmem:[%s3334_s1 + $0x60] sm:$0xff]   ;;  %v2439_v10 = vld [vmem:[%s3334_s1 + $0x68] sm:$0xff]  }
   0x4   :  { %2115 = vmatprep.subr.bf16.mxu0 %v2431_v2  ;;  %v2436_v7 = vld [vmem:[%s3334_s1 + $0x18] sm:$0xff]   ;;  %v2438_v9 = vld [vmem:[%s3334_s1 + $0x20] sm:$0xff]   ;;  %v2440_v12 = vld [vmem:[%s3334_s1 + $0x28] sm:$0xff]  }
   0x5   :  { %v2447_v11 = vld [vmem:[%s3335_s0 + $0x4] ss:$8 sps:$4 sm:$0xff]   ;;  %v2441_v13 = vld [vmem:[%s3334_s1 + $0x70] sm:$0xff]   ;;  %v2443_v15 = vld [vmem:[%s3334_s1 + $0x78] sm:$0xff]  }
   0x6   :  { %302 = vmatprep.mubr.bf16.mxu0 %v2447_v11  ;;  %v2442_v14 = vld [vmem:[%s3334_s1 + $0x30] sm:$0xff]   ;;  %v2444_v16 = vld [vmem:[%s3334_s1 + $0x38] sm:$0xff]   ;;  %v2445_v17 = vld [vmem:[%s3335_s0] ss:$8 sps:$4 sm:$0xff]  }
   0x7   :  { %2116 = vmatpush3.bf16.msra.mxu0 %v2432_v3  ;;  %v2448_v18 = vld [vmem:[%s3335_s0 + $0x14] ss:$8 sps:$4 sm:$0xff]   ;;  %v2450_v19 = vld [vmem:[%s3335_s0 + $0x10] ss:$8 sps:$4 sm:$0xff]   ;;  %v2451_v20 = vld [vmem:[%s3335_s0 + $0x24] ss:$8 sps:$4 sm:$0xff]  }
   0x8   :  { %2117 = vmatprep.subr.bf16.mxu0 %v2433_v4  ;;  %v2453_v21 = vld [vmem:[%s3335_s0 + $0x20] ss:$8 sps:$4 sm:$0xff]   ;;  %v2454_v22 = vld [vmem:[%s3335_s0 + $0x34] ss:$8 sps:$4 sm:$0xff]   ;;  %v2456_v23 = vld [vmem:[%s3335_s0 + $0x30] ss:$8 sps:$4 sm:$0xff]  }
   0x9   :  { %v2457_v24 = vld [vmem:[%s3335_s0 + $0x44] ss:$8 sps:$4 sm:$0xff]   ;;  %v2459_v25 = vld [vmem:[%s3335_s0 + $0x40] ss:$8 sps:$4 sm:$0xff]   ;;  %v2460_v26 = vld [vmem:[%s3335_s0 + $0x54] ss:$8 sps:$4 sm:$0xff]  }
   0xa   :  { %v2462_v27 = vld [vmem:[%s3335_s0 + $0x50] ss:$8 sps:$4 sm:$0xff]   ;;  %v2463_v28 = vld [vmem:[%s3335_s0 + $0x64] ss:$8 sps:$4 sm:$0xff]   ;;  %v2465_v29 = vld [vmem:[%s3335_s0 + $0x60] ss:$8 sps:$4 sm:$0xff]  }
   0xb   :  { %2118 = vmatpush3.bf16.msra.mxu0 %v2434_v5  ;;  %v2466_v30 = vld [vmem:[%s3335_s0 + $0x74] ss:$8 sps:$4 sm:$0xff]   ;;  %v2468_v31 = vld [vmem:[%s3335_s0 + $0x70] ss:$8 sps:$4 sm:$0xff]   ;;  %v2758_v38 = vld [vmem:[%s3336_s2] ss:$0 sm:$0xff] }
   0xc   :  { %2119 = vmatprep.subr.bf16.mxu0 %v2435_v6  ;;  %v2469_v62 = vld [vmem:[%s3337_s3 + $0x40] sm:$0xff]   ;;  %v2471_v2 = vld [vmem:[%s3337_s3 + $0x48] sm:$0xff]   ;;  %v2473_v5 = vld [vmem:[%s3337_s3 + $0x50] sm:$0xff]  }
   0xd   :  { %v2470_v1 = vld [vmem:[%s3337_s3] sm:$0xff]   ;;  %2177 = vmatprep.subr.bf16.mxu1 %v2469_v62  ;;  %v2472_v4 = vld [vmem:[%s3337_s3 + $0x8] sm:$0xff]   ;;  %vm3144_vm5 = vmpackc.low %vm956_vm4, %vm956_vm4 }
   0xe   :  { %2178 = vmatpush3.bf16.msra.mxu1 %v2470_v1 }
   0xf   :  { %2120 = vmatpush3.bf16.msra.mxu0 %v2436_v7  ;;  %2179 = vmatprep.subr.bf16.mxu1 %v2471_v2 }
  0x10   :  { %2121 = vmatprep.subr.bf16.mxu0 %v2437_v8 }
  0x12   :  { %2180 = vmatpush3.bf16.msra.mxu1 %v2472_v4 }
  0x13   :  { %2122 = vmatpush3.bf16.msra.mxu0 %v2438_v9  ;;  %2181 = vmatprep.subr.bf16.mxu1 %v2473_v5 }
  0x14   :  { %2123 = vmatprep.subr.bf16.mxu0 %v2439_v10 }
  0x17   :  { %2124 = vmatpush3.bf16.msra.mxu0 %v2440_v12 }
  0x18   :  { %2125 = vmatprep.subr.bf16.mxu0 %v2441_v13  ;;  %v2474_v13 = vld [vmem:[%s3337_s3 + $0x10] sm:$0xff]  }
  0x19   :  { %2182 = vmatpush3.bf16.msra.mxu1 %v2474_v13  ;;  %v2481_v13 = vld [vmem:[%s3337_s3 + $0x70] sm:$0xff]  }
  0x1b   :  { %2126 = vmatpush3.bf16.msra.mxu0 %v2442_v14 }
  0x1c   :  { %2127 = vmatprep.subr.bf16.mxu0 %v2443_v15 }
  0x1f   :  { %2128 = vmatpush3.bf16.msra.mxu0 %v2444_v16 }
  0x22   :  { %303 = vmatmul.mubr.bf16.vlgmr.msra.gmra.mrb[0].mxu0 %v2445_v17 }
  0x23   :  { %310 = vmatprep.mubr.bf16.mxu0 %v2448_v18 }
  0x2a   :  { %311 = vmatmul.mubr.bf16.gmra.mrb[4].mxu0 %v2450_v19 }
  0x2b   :  { %318 = vmatprep.mubr.bf16.mxu0 %v2451_v20 }
  0x32   :  { %319 = vmatmul.mubr.bf16.gmra.mrb[8].mxu0 %v2453_v21 }
  0x33   :  { %326 = vmatprep.mubr.bf16.mxu0 %v2454_v22 }
  0x3a   :  { %327 = vmatmul.mubr.bf16.gmra.mrb[12].mxu0 %v2456_v23 }
  0x3b   :  { %334 = vmatprep.mubr.bf16.mxu0 %v2457_v24 }
  0x42   :  { %335 = vmatmul.mubr.bf16.gmra.mrb[16].mxu0 %v2459_v25 }
  0x43   :  { %342 = vmatprep.mubr.bf16.mxu0 %v2460_v26 }
  0x4a   :  { %343 = vmatmul.mubr.bf16.gmra.mrb[20].mxu0 %v2462_v27 }
  0x4b   :  { %350 = vmatprep.mubr.bf16.mxu0 %v2463_v28 }
  0x52   :  { %351 = vmatmul.mubr.bf16.gmra.mrb[24].mxu0 %v2465_v29 }
  0x53   :  { %358 = vmatprep.mubr.bf16.mxu0 %v2466_v30 }
  0x5a   :  { %359 = vmatmul.mubr.bf16.gmra.mrb[28].mxu0 %v2468_v31 }
  0xf5   :  { %v2129_v32 = vpop.f32.mrb[0].mxu0 }
  0xf6   :  { %v2130_v33 = vpop.f32.mrb[1].mxu0 }
  0xf7   :  { %v2131_v34 = vadd.f32 %v2130_v33, %v2129_v32  ;;  %v2132_v35 = vpop.f32.mrb[2].mxu0 }
  0xf8   :  { %v2133_v36 = vpop.f32.mrb[3].mxu0 }
  0xf9   :  { %v2134_v37 = vadd.f32 %v2133_v36, %v2132_v35  ;;  %v2764_v40 = vadd.f32 %v2131_v34, %v2758_v38 }
  0xfb   :  { %v2761_v39 = vadd.f32 %v2134_v37, %v2758_v38  ;;  %v367_v47 = vmax.f32 %v2764_v40, 0.0 }
  0xfd   :  { %v2135_v41 = vpop.f32.mrb[4].mxu0  ;;  %v368_v43 = vmax.f32 %v2761_v39, 0.0  ;;  %v404_v52 = vrot.slane %v367_v47, 2 }
  0xfe   :  { %v2136_v42 = vpop.f32.mrb[5].mxu0 }
  0xff   :  { %v2137_v44 = vadd.f32 %v2136_v42, %v2135_v41  ;;  %v2138_v45 = vpop.f32.mrb[6].mxu0  ;;  %v405_v50 = vrot.slane %v368_v43, 2  ;;  %v2475_v41 = vld [vmem:[%s3337_s3 + $0x58] sm:$0xff]  }
 0x100   :  { %v2139_v46 = vpop.f32.mrb[7].mxu0  ;;  %2183 = vmatprep.subr.bf16.mxu1 %v2475_v41  ;;  %v2485_v41 = vld [vmem:[%s3337_s3 + $0xc0] sm:$0xff]  }
 0x101   :  { %v2769_v48 = vadd.f32 %v2137_v44, %v2758_v38  ;;  %v2771_v49 = vadd.f32 %v2139_v46, %v2138_v45  ;;  %v406_v58 = vsel %vm403_vm0, %v404_v52, %v405_v50  ;;  %v2476_v45 = vld [vmem:[%s3337_s3 + $0x18] sm:$0xff]  }
 0x102   :  { %2184 = vmatpush3.bf16.msra.mxu1 %v2476_v45 }
 0x103   :  { %v369_v51 = vmax.f32 %v2769_v48, 0.0  ;;  %v2868_v4 = vadd.f32 %v2771_v49, %v2758_v38 }
 0x105   :  { %v2780_v53 = vrot.slane %v369_v51, 2  ;;  %v2141_v54 = vpop.f32.mrb[8].mxu0 }
 0x106   :  { %v2142_v55 = vpop.f32.mrb[9].mxu0 }
 0x107   :  { %v2143_v56 = vadd.f32 %v2142_v55, %v2141_v54  ;;  %v2144_v57 = vpop.f32.mrb[10].mxu0  ;;  %v408_v59 = vsel %vm403_vm0, %v405_v50, %v2780_v53 }
 0x108   :  { %v2145_v60 = vpop.f32.mrb[11].mxu0  ;;  %v2344_v61 = vpack.i.bf16 %v408_v59, %v406_v58  ;;  %v2477_v58 = vld [vmem:[%s3337_s3 + $0x60] sm:$0xff]  }
 0x109   :  { %v321_v63 = vadd.f32 %v2143_v56, %v2758_v38  ;;  %v2146_v0 = vadd.f32 %v2145_v60, %v2144_v57  ;;  %2185 = vmatprep.subr.bf16.mxu1 %v2477_v58 }
 0x10a   :  { %2345 = vrot.lane.b32.xlu1 %v2344_v61, %s2593_s26  ;;  %v2478_v61 = vld [vmem:[%s3337_s3 + $0x20] sm:$0xff]  }
 0x10b   :  { %v324_v3 = vadd.f32 %v2146_v0, %v2758_v38  ;;  %v2803_v6 = vmax.f32 %v321_v63, 0.0  ;;  %2186 = vmatpush3.bf16.msra.mxu1 %v2478_v61  ;;  %v2479_v0 = vld [vmem:[%s3337_s3 + $0x68] sm:$0xff]  }
 0x10c   :  { %2187 = vmatprep.subr.bf16.mxu1 %v2479_v0  ;;  %v2596_v0 = vmov 0.0  }
 0x10d   :  { %v372_v7 = vmax.f32 %v324_v3, 0.0  ;;  %v2147_v8 = vpop.f32.mrb[12].mxu0  ;;  %v411_v18 = vrot.slane %v2803_v6, 2  ;;  %v2480_v3 = vld [vmem:[%s3337_s3 + $0x28] sm:$0xff]  }
 0x10e   :  { %v2148_v9 = vpop.f32.mrb[13].mxu0 }
 0x10f   :  { %v2149_v10 = vadd.f32 %v2148_v9, %v2147_v8  ;;  %v2150_v11 = vpop.f32.mrb[14].mxu0  ;;  %v2349_v12 = vpack.i.bf16 %v372_v7, %v2803_v6  ;;  %v426_v14 = vrot.slane %v372_v7, 2  ;;  %2188 = vmatpush3.bf16.msra.mxu1 %v2480_v3 }
 0x110   :  { %v2151_v15 = vpop.f32.mrb[15].mxu0  ;;  %2189 = vmatprep.subr.bf16.mxu1 %v2481_v13 }
 0x111   :  { %v329_v16 = vadd.f32 %v2149_v10, %v2758_v38  ;;  %v2152_v17 = vadd.f32 %v2151_v15, %v2150_v11  ;;  %2350 = vrot.lane.b32.xlu0 %v2349_v12, %s2594_s16  ;;  %v2816_v25 = vsel %vm403_vm0, %v411_v18, %v426_v14  ;;  %v2482_v15 = vld [vmem:[%s3337_s3 + $0x30] sm:$0xff]  }
 0x113   :  { %v373_v19 = vmax.f32 %v329_v16, 0.0  ;;  %v332_v20 = vadd.f32 %v2152_v17, %v2758_v38  ;;  %v370_v16 = vmax.f32 %v2868_v4, 0.0  ;;  %2190 = vmatpush3.bf16.msra.mxu1 %v2482_v15 }
 0x115   :  { %v428_v21 = vrot.slane %v373_v19, 2  ;;  %v374_v22 = vmax.f32 %v332_v20, 0.0  ;;  %v2153_v23 = vpop.f32.mrb[16].mxu0  ;;  %v2483_v20 = vld [vmem:[%s3337_s3 + $0x78] sm:$0xff]  }
 0x116   :  { %v2154_v24 = vpop.f32.mrb[17].mxu0  ;;  %2191 = vmatprep.subr.bf16.mxu1 %v2483_v20 }
 0x117   :  { %v430_v26 = vrot.slane %v374_v22, 2  ;;  %v2155_v27 = vadd.f32 %v2154_v24, %v2153_v23  ;;  %v2156_v28 = vpop.f32.mrb[18].mxu0  ;;  %v429_v29 = vsel %vm403_vm0, %v426_v14, %v428_v21  ;;  %v2819_v30 = vpack.i.bf16 %v374_v22, %v373_v19  ;;  %v2484_v23 = vld [vmem:[%s3337_s3 + $0x38] sm:$0xff]  }
 0x118   :  { %v2157_v31 = vpop.f32.mrb[19].mxu0  ;;  %v2369_v32 = vpack.i.bf16 %v429_v29, %v2816_v25  ;;  %v409_v24 = vrot.slane %v370_v16, 2  ;;  %2192 = vmatpush3.bf16.msra.mxu1 %v2484_v23 }
 0x119   :  { %v337_v33 = vadd.f32 %v2155_v27, %v2758_v38  ;;  %v2158_v34 = vadd.f32 %v2157_v31, %v2156_v28  ;;  %v2824_v35 = vsel %vm403_vm0, %v428_v21, %v430_v26  ;;  %2205 = vmatprep.subr.bf16.mxu1 %v2485_v41 }
 0x11a   :  { %v410_v58 = vsel %vm403_vm0, %v2780_v53, %v409_v24 }
 0x11b   :  { %v2826_v36 = vmax.f32 %v337_v33, 0.0  ;;  %v2829_v37 = vadd.f32 %v2158_v34, %v2758_v38 }
 0x11d   :  { %v432_v42 = vrot.slane %v2826_v36, 2  ;;  %v2159_v44 = vpop.f32.mrb[20].mxu0  ;;  %v376_v50 = vmax.f32 %v2829_v37, 0.0 }
 0x11e   :  { %v2160_v46 = vpop.f32.mrb[21].mxu0 }
 0x11f   :  { %v2161_v52 = vadd.f32 %v2160_v46, %v2159_v44  ;;  %v2162_v54 = vpop.f32.mrb[22].mxu0  ;;  %v2840_v55 = vsel %vm403_vm0, %v430_v26, %v432_v42  ;;  %v465_v62 = vrot.slane %v376_v50, 2 }
 0x120   :  { %v2163_v56 = vpop.f32.mrb[23].mxu0  ;;  %v2399_v57 = vpack.i.bf16 %v2840_v55, %v2824_v35  ;;  %v2404_v35 = vpack.i.bf16 %v2826_v36, %v2596_v0 }
 0x121   :  { %v2848_v59 = vadd.f32 %v2161_v52, %v2758_v38  ;;  %v2164_v60 = vadd.f32 %v2163_v56, %v2162_v54  ;;  %v2871_v9 = vsel %vm403_vm0, %v432_v42, %v465_v62 }
 0x123   :  { %v377_v63 = vmax.f32 %v2848_v59, 0.0  ;;  %v2912_v52 = vadd.f32 %v2164_v60, %v2758_v38 }
 0x125   :  { %v2861_v1 = vrot.slane %v377_v63, 2  ;;  %v2165_v2 = vpop.f32.mrb[24].mxu0 }
 0x126   :  { %v2166_v5 = vpop.f32.mrb[25].mxu0 }
 0x127   :  { %v2167_v7 = vadd.f32 %v2166_v5, %v2165_v2  ;;  %v2168_v8 = vpop.f32.mrb[26].mxu0  ;;  %v468_v10 = vsel %vm403_vm0, %v465_v62, %v2861_v1 }
 0x128   :  { %v2169_v11 = vpop.f32.mrb[27].mxu0  ;;  %v2354_v12 = vpack.i.bf16 %v468_v10, %v2871_v9 }
 0x129   :  { %v353_v49 = vadd.f32 %v2167_v7, %v2758_v38  ;;  %v2170_v14 = vadd.f32 %v2169_v11, %v2168_v8 }
 0x12a   :  { %2355 = vrot.lane.b32.xlu1 %v2354_v12, %s2593_s26 }
 0x12b   :  { %v2885_v17 = vmax.f32 %v353_v49, 0.0  ;;  %v356_v19 = vadd.f32 %v2170_v14, %v2758_v38 }
 0x12d   :  { %v380_v21 = vmax.f32 %v356_v19, 0.0  ;;  %v2171_v22 = vpop.f32.mrb[28].mxu0  ;;  %v471_v27 = vrot.slane %v2885_v17, 2 }
 0x12e   :  { %v2172_v26 = vpop.f32.mrb[29].mxu0  ;;  %2370 = vrot.lane.b32.xlu1 %v2369_v32, %s2595_s17  ;;  %v412_v32 = vsel %vm403_vm0, %v409_v24, %v411_v18 }
 0x12f   :  { %v486_v28 = vrot.slane %v380_v21, 2  ;;  %v2173_v29 = vadd.f32 %v2172_v26, %v2171_v22  ;;  %v2174_v31 = vpop.f32.mrb[30].mxu0  ;;  %v2359_v33 = vpack.i.bf16 %v380_v21, %v2885_v17  ;;  %v2389_v61 = vpack.i.bf16 %v412_v32, %v410_v58 }
 0x130   :  { %v2175_v34 = vpop.f32.mrb[31].mxu0 }
 0x131   :  { %v361_v42 = vadd.f32 %v2173_v29, %v2758_v38  ;;  %v2176_v44 = vadd.f32 %v2175_v34, %v2174_v31  ;;  %2360 = vrot.lane.b32.xlu0 %v2359_v33, %s2594_s16  ;;  %v487_v45 = vsel %vm403_vm0, %v471_v27, %v486_v28 }
 0x132   :  { %2380 = vrot.lane.b32.xlu1 %v2819_v30, %s2594_s16  ;;  %v2409_v46 = vpack.i.bf16 %v2816_v25, %v487_v45  ;;  %v492_v30 = vrot.slane %v2596_v0, 2  ;;  %v378_v25 = vmax.f32 %v2912_v52, 0.0 }
 0x133   :  { %v381_v54 = vmax.f32 %v361_v42, 0.0  ;;  %v364_v56 = vadd.f32 %v2176_v44, %v2758_v38 }
 0x134   :  { %v469_v8 = vrot.slane %v378_v25, 2  ;;  %v2414_v55 = vpack.i.bf16 %v2871_v9, %v492_v30 }
 0x135   :  { %v488_v62 = vrot.slane %v381_v54, 2  ;;  %v382_v18 = vmax.f32 %v364_v56, 0.0  ;;  %v2486_v56 = vld [vmem:[%s3337_s3 + $0x80] sm:$0xff]  }
 0x136   :  { %2390 = vrot.lane.b32.xlu1 %v2389_v61, %s2593_s26  ;;  %v472_v10 = vsel %vm403_vm0, %v469_v8, %v471_v27  ;;  %v470_v11 = vsel %vm403_vm0, %v2861_v1, %v469_v8  ;;  %v2487_v61 = vld [vmem:[%s3337_s3 + $0xc8] sm:$0xff]  }
 0x137   :  { %v490_v2 = vrot.slane %v382_v18, 2  ;;  %v489_v60 = vsel %vm403_vm0, %v486_v28, %v488_v62  ;;  %v2374_v3 = vpack.i.bf16 %v382_v18, %v381_v54  ;;  %v2384_v12 = vpack.i.bf16 %v472_v10, %v470_v11 }
 0x138   :  { %v2364_v5 = vpack.i.bf16 %v489_v60, %v487_v45 }
 0x139   :  { %v491_v38 = vsel %vm403_vm0, %v488_v62, %v490_v2  ;;  %v493_v7 = vsel %vm403_vm0, %v490_v2, %v492_v30 }
 0x13a   :  { %2365 = vrot.lane.b32.xlu0 %v2364_v5, %s2595_s17  ;;  %2400 = vrot.lane.b32.xlu1 %v2399_v57, %s2595_s17  ;;  %v2394_v53 = vpack.i.bf16 %v493_v7, %v491_v38  ;;  %v2488_v5 = vld [vmem:[%s3337_s3 + $0x88] sm:$0xff]  }
 0x13e   :  { %2375 = vrot.lane.b32.xlu0 %v2374_v3, %s2594_s16  ;;  %2410 = vrot.lane.b32.xlu1 %v2409_v46, %s2593_s26 }
 0x142   :  { %2385 = vrot.lane.b32.xlu0 %v2384_v12, %s2593_s26 }
 0x146   :  { %2395 = vrot.lane.b32.xlu0 %v2394_v53, %s2595_s17  ;;  %v2489_v53 = vld [vmem:[%s3337_s3 + $0xd0] sm:$0xff]  }
 0x14a   :  { %2405 = vrot.lane.b32.xlu0 %v2404_v35, %s2594_s16 }
 0x14e   :  { %2415 = vrot.lane.b32.xlu0 %v2414_v55, %s2595_s17 }
 0x17c   :  { %v2346_v57 = vpop.permute.xlu1 %2345 }
 0x17d   :  { %v2348_v27 = vunpack.i.h.bf16 %v2346_v57  ;;  %v2347_v28 = vunpack.i.l.bf16 %v2346_v57 }
 0x183   :  { %v2351_v49 = vpop.permute.xlu0 %2350 }
 0x184   :  { %v2353_v1 = vunpack.i.h.bf16 %v2351_v49  ;;  %v2352_v19 = vunpack.i.l.bf16 %v2351_v49 }
 0x186   :  { %v526_v23 = vsel %vm525_vm1, %v367_v47, %v2352_v19  ;;  %v527_v9 = vsel %vm525_vm1, %v368_v43, %v2353_v1 }
 0x187   :  { %v531_v39 = vsel %vm530_vm2, %v526_v23, %v2347_v28  ;;  %v532_v43 = vsel %vm530_vm2, %v527_v9, %v2348_v27  ;;  %v2493_v23 = vld [vmem:[%s3337_s3 + $0xe0] sm:$0xff]   ;;  %v2496_v28 = vld [vmem:[%s3337_s3 + $0xa8] sm:$0xff]  }
 0x19c   :  { %v2356_v13 = vpop.permute.xlu1 %2355 }
 0x19d   :  { %v2358_v33 = vunpack.i.h.bf16 %v2356_v13  ;;  %v2357_v34 = vunpack.i.l.bf16 %v2356_v13 }
 0x1a0   :  { %v2371_v14 = vpop.permute.xlu1 %2370 }
 0x1a1   :  { %v2373_v24 = vunpack.i.h.bf16 %v2371_v14  ;;  %v2372_v26 = vunpack.i.l.bf16 %v2371_v14  ;;  %v2490_v14 = vld [vmem:[%s3337_s3 + $0x90] sm:$0xff]  }
 0x1a3   :  { %v2361_v15 = vpop.permute.xlu0 %2360  ;;  %v2959_v37 = vsel %vm535_vm3, %v532_v43, %v2373_v24  ;;  %v2494_v24 = vld [vmem:[%s3337_s3 + $0xa0] sm:$0xff]   ;;  %v2500_v43 = vld [vmem:[%s3337_s3 + $0xb8] sm:$0xff]  }
 0x1a4   :  { %v2363_v20 = vunpack.i.h.bf16 %v2361_v15  ;;  %v2362_v21 = vunpack.i.l.bf16 %v2361_v15  ;;  %v2381_v22 = vpop.permute.xlu1 %2380  ;;  %v2491_v15 = vld [vmem:[%s3337_s3 + $0xd8] sm:$0xff]  }
 0x1a5   :  { %v2383_v62 = vunpack.i.h.bf16 %v2381_v22  ;;  %v2382_v18 = vunpack.i.l.bf16 %v2381_v22 }
 0x1a6   :  { %v540_v29 = vsel %vm525_vm1, %v2826_v36, %v2362_v21  ;;  %v541_v31 = vsel %vm525_vm1, %v376_v50, %v2363_v20  ;;  %v536_v36 = vsel %vm535_vm3, %v531_v39, %v2372_v26  ;;  %v2492_v21 = vld [vmem:[%s3337_s3 + $0x98] sm:$0xff]   ;;  %v2495_v26 = vld [vmem:[%s3337_s3 + $0xe8] sm:$0xff]  }
 0x1a7   :  { %v544_v44 = vsel %vm530_vm2, %v540_v29, %v2357_v34  ;;  %v545_v32 = vsel %vm530_vm2, %v541_v31, %v2358_v33  ;;  %v558_v58 = vpack.c.bf16 %v2959_v37, %v536_v36  ;;  %v529_v35 = vsel %vm525_vm1, %v370_v16, %v2383_v62  ;;  %v2497_v29 = vld [vmem:[%s3337_s3 + $0xf0] sm:$0xff]   ;;  %v2501_v62 = vld [vmem:[%s3338_s5 + $0x40] sm:$0xff]  }
 0x1a8   :  { %v2391_v41 = vpop.permute.xlu1 %2390  ;;  %v528_v55 = vsel %vm525_vm1, %v369_v51, %v2382_v18  ;;  %v2498_v34 = vld [vmem:[%s3337_s3 + $0xb0] sm:$0xff]   ;;  %2233 = vmatprep.subr.bf16.mxu0 %v2501_v62  ;;  %v2504_v18 = vld [vmem:[%s3338_s5 + $0x8] sm:$0xff]  }
 0x1a9   :  { %v2393_v2 = vunpack.i.h.bf16 %v2391_v41  ;;  %v2392_v60 = vunpack.i.l.bf16 %v2391_v41  ;;  %v2499_v41 = vld [vmem:[%s3337_s3 + $0xf8] sm:$0xff]  }
 0x1ab   :  { %v533_v57 = vsel %vm530_vm2, %v528_v55, %v2392_v60  ;;  %v534_v13 = vsel %vm530_vm2, %v529_v35, %v2393_v2  ;;  %v2506_v2 = vld [vmem:[%s3338_s5 + $0x10] sm:$0xff]   ;;  %v2507_v60 = vld [vmem:[%s3338_s5 + $0x58] sm:$0xff]  }
 0x1ac   :  { %v2366_v40 = vpop.permute.xlu0 %2365  ;;  %v2401_v30 = vpop.permute.xlu1 %2400  ;;  %v2517_v35 = vld [vmem:[%s3338_s5 + $0x70] sm:$0xff]  }
 0x1ad   :  { %v2368_v47 = vunpack.i.h.bf16 %v2366_v40  ;;  %v2367_v42 = vunpack.i.l.bf16 %v2366_v40  ;;  %v2403_v8 = vunpack.i.h.bf16 %v2401_v30  ;;  %v2402_v10 = vunpack.i.l.bf16 %v2401_v30  ;;  %v2505_v30 = vld [vmem:[%s3338_s5 + $0x50] sm:$0xff]  }
 0x1ae   :  { %v2519_v55 = vld [vmem:[%s3338_s5 + $0xd0] sm:$0xff]  }
 0x1af   :  { %v548_v50 = vsel %vm535_vm3, %v544_v44, %v2367_v42  ;;  %v549_v45 = vsel %vm535_vm3, %v545_v32, %v2368_v47  ;;  %v538_v20 = vsel %vm535_vm3, %v533_v57, %v2402_v10  ;;  %v539_v52 = vsel %vm535_vm3, %v534_v13, %v2403_v8  ;;  %v2515_v8 = vld [vmem:[%s3338_s5 + $0xc8] sm:$0xff]   ;;  %v2520_v57 = vld [vmem:[%s3338_s5 + $0x90] sm:$0xff]   ;;  %v2521_v13 = vld [vmem:[%s3338_s5 + $0xd8] sm:$0xff]  }
 0x1b0   :  { %v2376_v46 = vpop.permute.xlu0 %2375  ;;  %v559_v54 = vpack.c.bf16 %v549_v45, %v548_v50  ;;  %v562_v22 = vpack.c.bf16 %v539_v52, %v538_v20  ;;  %v2411_v40 = vpop.permute.xlu1 %2410  ;;  %v560_v50 = vpack.c.bf16 %v538_v20, %v2959_v37  ;;  %v2502_v37 = vld [vmem:[%s3338_s5] sm:$0xff]   ;;  %v2516_v10 = vld [vmem:[%s3338_s5 + $0x88] sm:$0xff]  }
 0x1b1   :  { %v2378_v38 = vunpack.i.h.bf16 %v2376_v46  ;;  %v2377_v7 = vunpack.i.l.bf16 %v2376_v46  ;;  %v2412_v39 = vunpack.i.l.bf16 %v2411_v40  ;;  %2234 = vmatpush3.bf16.msra.mxu0 %v2502_v37 }
 0x1b2   :  { %861 = vmatprep.mubr.bf16.mxu1 %v559_v54  ;;  %v2413_v54 = vunpack.i.h.bf16 %v2411_v40  ;;  %v2529_v40 = vld [vmem:[%s3338_s5 + $0xf0] sm:$0xff]  }
 0x1b3   :  { %862 = vmatmul.mubr.bf16.vlgmr.msra.gmra.mrb[0].mxu1 %v558_v58  ;;  %v543_v4 = vsel %vm525_vm1, %v378_v25, %v2378_v38  ;;  %v542_v48 = vsel %vm525_vm1, %v377_v63, %v2377_v7  ;;  %v2513_v38 = vld [vmem:[%s3338_s5 + $0xc0] sm:$0xff]  }
 0x1b4   :  { %2206 = vmatpush3.bf16.msra.mxu1 %v2486_v56  ;;  %v2386_v3 = vpop.permute.xlu0 %2385  ;;  %v2510_v7 = vld [vmem:[%s3338_s5 + $0x20] sm:$0xff]  }
 0x1b5   :  { %2207 = vmatprep.subr.bf16.mxu1 %v2487_v61  ;;  %v2388_v11 = vunpack.i.h.bf16 %v2386_v3  ;;  %v2387_v12 = vunpack.i.l.bf16 %v2386_v3  ;;  %v2508_v3 = vld [vmem:[%s3338_s5 + $0x18] sm:$0xff]  }
 0x1b7   :  { %v546_v1 = vsel %vm530_vm2, %v542_v48, %v2387_v12  ;;  %v547_v19 = vsel %vm530_vm2, %v543_v4, %v2388_v11  ;;  %v2511_v11 = vld [vmem:[%s3338_s5 + $0x68] sm:$0xff]   ;;  %v2523_v4 = vld [vmem:[%s3338_s5 + $0x78] sm:$0xff]   ;;  %v2525_v48 = vld [vmem:[%s3338_s5 + $0xe0] sm:$0xff]  }
 0x1b8   :  { %2208 = vmatpush3.bf16.msra.mxu1 %v2488_v5  ;;  %v2396_v49 = vpop.permute.xlu0 %2395  ;;  %v2509_v5 = vld [vmem:[%s3338_s5 + $0x60] sm:$0xff]   ;;  %v2512_v12 = vld [vmem:[%s3338_s5 + $0x28] sm:$0xff]  }
 0x1b9   :  { %v2398_v16 = vunpack.i.h.bf16 %v2396_v49  ;;  %v2397_v51 = vunpack.i.l.bf16 %v2396_v49  ;;  %2209 = vmatprep.subr.bf16.mxu1 %v2489_v53  ;;  %v2514_v53 = vld [vmem:[%s3338_s5 + $0x80] sm:$0xff]   ;;  %v2518_v49 = vld [vmem:[%s3338_s5 + $0x30] sm:$0xff]  }
 0x1bb   :  { %v550_v25 = vsel %vm535_vm3, %v546_v1, %v2397_v51  ;;  %v551_v59 = vsel %vm535_vm3, %v547_v19, %v2398_v16  ;;  %v2524_v16 = vld [vmem:[%s3338_s5 + $0x38] sm:$0xff]   ;;  %v2526_v51 = vld [vmem:[%s3338_s5 + $0xa0] sm:$0xff]  }
 0x1bc   :  { %2210 = vmatpush3.bf16.msra.mxu1 %v2490_v14  ;;  %v563_v63 = vpack.c.bf16 %v551_v59, %v550_v25  ;;  %v561_v9 = vpack.c.bf16 %v550_v25, %v549_v45  ;;  %v2406_v27 = vpop.permute.xlu0 %2405  ;;  %v2522_v14 = vld [vmem:[%s3338_s5 + $0x98] sm:$0xff]  }
 0x1bd   :  { %2211 = vmatprep.subr.bf16.mxu1 %v2491_v15  ;;  %v2407_v31 = vunpack.i.l.bf16 %v2406_v27  ;;  %v2408_v44 = vunpack.i.h.bf16 %v2406_v27  ;;  %v2528_v27 = vld [vmem:[%s3338_s5 + $0xa8] sm:$0xff]  }
 0x1be   :  { %869 = vmatprep.mubr.bf16.mxu1 %v563_v63 }
 0x1bf   :  { %870 = vmatmul.mubr.bf16.gmra.mrb[4].mxu1 %v562_v22  ;;  %v555_v47 = vsel %vm525_vm1, %v2885_v17, %v2407_v31  ;;  %v552_v45 = vsel %vm525_vm1, %v2803_v6, %v2408_v44  ;;  %v2503_v6 = vld [vmem:[%s3338_s5 + $0x48] sm:$0xff]  }
 0x1c0   :  { %2212 = vmatpush3.bf16.msra.mxu1 %v2492_v21  ;;  %909 = vmatprep.mubr.bf16.mxu1 %v561_v9  ;;  %v2416_v33 = vpop.permute.xlu0 %2415  ;;  %v556_v32 = vsel %vm530_vm2, %v555_v47, %v2412_v39  ;;  %v553_v56 = vsel %vm530_vm2, %v552_v45, %v2413_v54  ;;  %v1979_v9 = vld [vmem:[%s3339_s4] ss:$0 sm:$0xff]  ;;  %v2531_v39 = vld [vmem:[%s3338_s5 + $0xb0] sm:$0xff]   ;;  %v2532_v45 = vld [vmem:[%s3338_s5 + $0xf8] sm:$0xff]  }
 0x1c1   :  { %2213 = vmatprep.subr.bf16.mxu1 %v2493_v23  ;;  %v2417_v42 = vunpack.i.l.bf16 %v2416_v33  ;;  %v2418_v17 = vunpack.i.h.bf16 %v2416_v33  ;;  %2235 = vmatprep.subr.bf16.mxu0 %v2503_v6 }
 0x1c2   :  { %2236 = vmatpush3.bf16.msra.mxu0 %v2504_v18 }
 0x1c3   :  { %v557_v36 = vsel %vm535_vm3, %v556_v32, %v2417_v42  ;;  %v554_v58 = vsel %vm535_vm3, %v553_v56, %v2418_v17  ;;  %2237 = vmatprep.subr.bf16.mxu0 %v2505_v30 }
 0x1c4   :  { %2214 = vmatpush3.bf16.msra.mxu1 %v2494_v24  ;;  %v565_v46 = vpack.c.bf16 %v557_v36, %v551_v59  ;;  %v564_v61 = vpack.c.bf16 %v554_v58, %v539_v52  ;;  %v2527_v24 = vld [vmem:[%s3338_s5 + $0xe8] sm:$0xff]  }
 0x1c5   :  { %2215 = vmatprep.subr.bf16.mxu1 %v2495_v26 }
 0x1c6   :  { %2238 = vmatpush3.bf16.msra.mxu0 %v2506_v2 }
 0x1c7   :  { %2239 = vmatprep.subr.bf16.mxu0 %v2507_v60 }
 0x1c8   :  { %2216 = vmatpush3.bf16.msra.mxu1 %v2496_v28 }
 0x1c9   :  { %2217 = vmatprep.subr.bf16.mxu1 %v2497_v29 }
 0x1ca   :  { %2240 = vmatpush3.bf16.msra.mxu0 %v2508_v3 }
 0x1cb   :  { %2241 = vmatprep.subr.bf16.mxu0 %v2509_v5 }
 0x1cc   :  { %2218 = vmatpush3.bf16.msra.mxu1 %v2498_v34 }
 0x1cd   :  { %2219 = vmatprep.subr.bf16.mxu1 %v2499_v41 }
 0x1ce   :  { %2242 = vmatpush3.bf16.msra.mxu0 %v2510_v7 }
 0x1cf   :  { %2243 = vmatprep.subr.bf16.mxu0 %v2511_v11 }
 0x1d0   :  { %2220 = vmatpush3.bf16.msra.mxu1 %v2500_v43 }
 0x1d1   :  { %2255 = vmatprep.subr.bf16.mxu1 %v2513_v38 }
 0x1d2   :  { %2244 = vmatpush3.bf16.msra.mxu0 %v2512_v12  ;;  %v2530_v12 = vld [vmem:[%s3338_s5 + $0x100] sm:$0xff]  }
 0x1d3   :  { %910 = vmatmul.mubr.bf16.vlgmr.msra.gmra.mrb[8].mxu1 %v560_v50  ;;  %2245 = vmatprep.subr.bf16.mxu0 %v2517_v35 }
 0x1d4   :  { %917 = vmatprep.mubr.bf16.mxu1 %v565_v46  ;;  %2256 = vmatpush3.bf16.msra.mxu1 %v2514_v53  ;;  %v2534_v46 = vld [vmem:[%s3338_s5 + $0xb8] sm:$0xff]  }
 0x1d5   :  { %2257 = vmatprep.subr.bf16.mxu1 %v2515_v8  ;;  %v2570_v8 = vld [vmem:[%s3341_s9 + $0xd0] sm:$0xff]  }
 0x1d6   :  { %2246 = vmatpush3.bf16.msra.mxu0 %v2518_v49 }
 0x1d7   :  { %2247 = vmatprep.subr.bf16.mxu0 %v2523_v4 }
 0x1d8   :  { %2258 = vmatpush3.bf16.msra.mxu1 %v2516_v10 }
 0x1d9   :  { %2259 = vmatprep.subr.bf16.mxu1 %v2519_v55  ;;  %v2533_v55 = vld [vmem:[%s3338_s5 + $0x108] sm:$0xff]  }
 0x1da   :  { %2248 = vmatpush3.bf16.msra.mxu0 %v2524_v16 }
 0x1db   :  { %918 = vmatmul.mubr.bf16.gmra.mrb[12].mxu1 %v564_v61  ;;  %2326 = vmatprep.subr.bf16.mxu0 %v2596_v0 }
 0x1dc   :  { %2260 = vmatpush3.bf16.msra.mxu1 %v2520_v57 }
 0x1dd   :  { %2261 = vmatprep.subr.bf16.mxu1 %v2521_v13 }
 0x1e0   :  { %2262 = vmatpush3.bf16.msra.mxu1 %v2522_v14 }
 0x1e1   :  { %2263 = vmatprep.subr.bf16.mxu1 %v2525_v48 }
 0x1e4   :  { %2264 = vmatpush3.bf16.msra.mxu1 %v2526_v51  ;;  %v2535_v51 = vld [vmem:[%s3338_s5 + $0x110] sm:$0xff]  }
 0x1e5   :  { %2265 = vmatprep.subr.bf16.mxu1 %v2527_v24  ;;  %v2549_v24 = vld [vmem:[%s3340_s7 + $0x40] ss:$16 sps:$4 sm:$0xff]  }
 0x1e8   :  { %2266 = vmatpush3.bf16.msra.mxu1 %v2528_v27  ;;  %v2552_v27 = vld [vmem:[%s3340_s7 + $0x48] ss:$16 sps:$4 sm:$0xff]  }
 0x1e9   :  { %2267 = vmatprep.subr.bf16.mxu1 %v2529_v40  ;;  %v2561_v40 = vld [vmem:[%s3341_s9 + $0x40] sm:$0xff]  }
 0x1ec   :  { %2268 = vmatpush3.bf16.msra.mxu1 %v2531_v39 }
 0x1ed   :  { %2269 = vmatprep.subr.bf16.mxu1 %v2532_v45 }
 0x1f0   :  { %2270 = vmatpush3.bf16.msra.mxu1 %v2534_v46 }
 0x286   :  { %v2193_v15 = vpop.f32.mrb[0].mxu1 }
 0x287   :  { %v2194_v1 = vpop.f32.mrb[1].mxu1 }
 0x288   :  { %v2195_v19 = vadd.f32 %v2194_v1, %v2193_v15  ;;  %v2196_v20 = vpop.f32.mrb[2].mxu1  ;;  %v2536_v1 = vld [vmem:[%s3338_s5 + $0x118] sm:$0xff]  }
 0x289   :  { %v2197_v52 = vpop.f32.mrb[3].mxu1 }
 0x28a   :  { %v2198_v25 = vadd.f32 %v2197_v52, %v2196_v20  ;;  %v864_v29 = vadd.f32 %v2195_v19, %v1979_v9  ;;  %v2537_v52 = vld [vmem:[%s3340_s7] ss:$16 sps:$4 sm:$0xff]  }
 0x28c   :  { %v867_v41 = vadd.f32 %v2198_v25, %v1979_v9  ;;  %v2539_v25 = vld [vmem:[%s3340_s7 + $0x4] ss:$16 sps:$4 sm:$0xff]  }
 0x28d   :  { %1508 = vmatprep.subr.bf16.mxu1 %v2539_v25  ;;  %v2589_v25 = vld [vmem:[%s3341_s9 + $0x78] sm:$0xff]  }
 0x292   :  { %v2199_v59 = vpop.f32.mrb[4].mxu1 }
 0x293   :  { %v2200_v63 = vpop.f32.mrb[5].mxu1 }
 0x294   :  { %v2201_v21 = vadd.f32 %v2200_v63, %v2199_v59  ;;  %v2202_v22 = vpop.f32.mrb[6].mxu1  ;;  %v2540_v59 = vld [vmem:[%s3340_s7 + $0x8] ss:$16 sps:$4 sm:$0xff]   ;;  %v2545_v63 = vld [vmem:[%s3340_s7 + $0x24] ss:$16 sps:$4 sm:$0xff]  }
 0x295   :  { %v2203_v23 = vpop.f32.mrb[7].mxu1  ;;  %v2543_v22 = vld [vmem:[%s3340_s7 + $0x20] ss:$16 sps:$4 sm:$0xff]  }
 0x296   :  { %v872_v54 = vadd.f32 %v2201_v21, %v1979_v9  ;;  %v2548_v21 = vld [vmem:[%s3340_s7 + $0x2c] ss:$16 sps:$4 sm:$0xff]   ;;  %v2546_v23 = vld [vmem:[%s3340_s7 + $0x28] ss:$16 sps:$4 sm:$0xff]   ;;  %v2551_v9 = vld [vmem:[%s3340_s7 + $0x44] ss:$16 sps:$4 sm:$0xff]  }
 0x2a6   :  { %v2221_v26 = vpop.f32.mrb[8].mxu1 }
 0x2a7   :  { %v2222_v28 = vpop.f32.mrb[9].mxu1 }
 0x2a8   :  { %v2223_v31 = vadd.f32 %v2222_v28, %v2221_v26  ;;  %v2224_v33 = vpop.f32.mrb[10].mxu1  ;;  %v2554_v26 = vld [vmem:[%s3340_s7 + $0x4c] ss:$16 sps:$4 sm:$0xff]   ;;  %v2557_v28 = vld [vmem:[%s3340_s7 + $0x64] ss:$16 sps:$4 sm:$0xff]  }
 0x2a9   :  { %v2225_v34 = vpop.f32.mrb[11].mxu1 }
 0x2aa   :  { %v912_v47 = vadd.f32 %v2223_v31, %v864_v29  ;;  %v2226_v42 = vadd.f32 %v2225_v34, %v2224_v33  ;;  %v2560_v29 = vld [vmem:[%s3340_s7 + $0x6c] ss:$16 sps:$4 sm:$0xff]   ;;  %v2555_v31 = vld [vmem:[%s3340_s7 + $0x60] ss:$16 sps:$4 sm:$0xff]   ;;  %v2558_v33 = vld [vmem:[%s3340_s7 + $0x68] ss:$16 sps:$4 sm:$0xff]  }
 0x2ab   :  { %v2598_v34 = vmov 0  }
 0x2ac   :  { %v925_v43 = vmax.f32 %v912_v47, 0.0  ;;  %v915_v44 = vadd.f32 %v2226_v42, %v867_v41  ;;  %v2562_v41 = vld [vmem:[%s3341_s9 + $0xc0] sm:$0xff]  }
 0x2ae   :  { %v926_v32 = vmax.f32 %v915_v44, 0.0  ;;  %v2227_v36 = vpop.f32.mrb[12].mxu1  ;;  %v929_v50 = vrot.slane %v925_v43, 2  ;;  %v933_v3 = vrot.slane %v925_v43, 4 }
 0x2af   :  { %v2228_v17 = vpop.f32.mrb[13].mxu1 }
 0x2b0   :  { %v2229_v56 = vadd.f32 %v2228_v17, %v2227_v36  ;;  %v2230_v58 = vpop.f32.mrb[14].mxu1  ;;  %v2419_v61 = vpack.i.bf16 %v929_v50, %v926_v32  ;;  %v941_v18 = vrot.slane %v926_v32, 4  ;;  %v939_v57 = vrot.slane %v926_v32, 2  ;;  %v2012_v32 = vld [vmem:[%s3342_s6] ss:$0 sm:$0xff] }
 0x2b1   :  { %v2231_v62 = vpop.f32.mrb[15].mxu1 }
 0x2b2   :  { %v920_v37 = vadd.f32 %v2229_v56, %v872_v54  ;;  %2420 = vrot.lane.b32.xlu1 %v2419_v61, %s2593_s26 }
 0x2b4   :  { %v927_v6 = vmax.f32 %v920_v37, 0.0 }
 0x2b6   :  { %v946_v30 = vrot.slane %v927_v6, 2  ;;  %v950_v15 = vrot.slane %v927_v6, 4 }
 0x2b8   :  { %v2424_v2 = vpack.i.bf16 %v941_v18, %v946_v30  ;;  %v961_v19 = vsel %vm956_vm4, %v950_v15, 0.0  ;;  %v2563_v30 = vld [vmem:[%s3341_s9] sm:$0xff]   ;;  %v2584_v15 = vld [vmem:[%s3341_s9 + $0xa8] sm:$0xff]  }
 0x2b9   :  { %v966_v20 = vpack.c.bf16 %v961_v19, %v961_v19  ;;  %v2586_v19 = vld [vmem:[%s3341_s9 + $0xf0] sm:$0xff]  }
 0x2ba   :  { %2425 = vrot.lane.b32.xlu0 %v2424_v2, %s2593_s26  ;;  %v2564_v2 = vld [vmem:[%s3341_s9 + $0x80] sm:$0xff]  }
 0x324   :  { %v2421_v60 = vpop.permute.xlu1 %2420 }
 0x325   :  { %v2423_v5 = vunpack.i.h.bf16 %v2421_v60  ;;  %v2422_v38 = vunpack.i.l.bf16 %v2421_v60 }
 0x327   :  { %v952_v7 = vsel %vm530_vm2, %v925_v43, %v2423_v5  ;;  %v953_v53 = vsel %vm530_vm2, %v933_v3, %v2422_v38  ;;  %v2565_v3 = vld [vmem:[%s3341_s9 + $0x48] sm:$0xff]  }
 0x328   :  { %v2053_v10 = vpack.c.bf16 %v952_v7, %v952_v7  ;;  %v2050_v11 = vpack.c.bf16 %v953_v53, %v953_v53  ;;  %v2566_v5 = vld [vmem:[%s3341_s9 + $0xc8] sm:$0xff]   ;;  %v2569_v53 = vld [vmem:[%s3341_s9 + $0x50] sm:$0xff]  }
 0x329   :  { %v2567_v38 = vld [vmem:[%s3341_s9 + $0x8] sm:$0xff]  }
 0x32a   :  { %2051 = vmatprep.mubr.msk.bf16.mxu0 %vm3144_vm5, %v2050_v11  ;;  %v2568_v7 = vld [vmem:[%s3341_s9 + $0x88] sm:$0xff]   ;;  %v2572_v11 = vld [vmem:[%s3341_s9 + $0x90] sm:$0xff]  }
 0x32b   :  { %2054 = vmatmul.mubr.msk.bf16.vlgmr.msra.gmra.mrb[32].mxu0 %vm3144_vm5, %v2053_v10  ;;  %v2571_v10 = vld [vmem:[%s3341_s9 + $0x10] sm:$0xff]  }
 0x32c   :  { %2327 = vmatpush3.bf16.msra.mxu0 %v2530_v12  ;;  %v2426_v35 = vpop.permute.xlu0 %2425  ;;  %2334 = vmatprep.mubr.msk.bf16.mxu0 %vm2597_vm6, %v2596_v0  ;;  %v2573_v12 = vld [vmem:[%s3341_s9 + $0x58] sm:$0xff]  }
 0x32d   :  { %v2428_v13 = vunpack.i.h.bf16 %v2426_v35  ;;  %v2427_v49 = vunpack.i.l.bf16 %v2426_v35  ;;  %2328 = vmatprep.subr.bf16.mxu0 %v2596_v0  ;;  %v2574_v35 = vld [vmem:[%s3341_s9 + $0xd8] sm:$0xff]  }
 0x32f   :  { %v954_v14 = vsel %vm530_vm2, %v939_v57, %v2428_v13  ;;  %v955_v4 = vsel %vm530_vm2, %v927_v6, %v2427_v49  ;;  %v2576_v57 = vld [vmem:[%s3341_s9 + $0x98] sm:$0xff]   ;;  %v2577_v13 = vld [vmem:[%s3341_s9 + $0x60] sm:$0xff]  }
 0x330   :  { %v2056_v48 = vpack.c.bf16 %v955_v4, %v955_v4  ;;  %v2059_v16 = vpack.c.bf16 %v954_v14, %v954_v14  ;;  %2329 = vmatpush3.bf16.msra.mxu0 %v2533_v55  ;;  %v2575_v55 = vld [vmem:[%s3341_s9 + $0x18] sm:$0xff]   ;;  %v2578_v49 = vld [vmem:[%s3341_s9 + $0xe0] sm:$0xff]  }
 0x331   :  { %2330 = vmatprep.subr.bf16.mxu0 %v2596_v0  ;;  %v2579_v14 = vld [vmem:[%s3341_s9 + $0x20] sm:$0xff]  }
 0x332   :  { %2057 = vmatprep.mubr.msk.bf16.mxu1 %vm3144_vm5, %v2056_v48  ;;  %v2580_v4 = vld [vmem:[%s3341_s9 + $0xa0] sm:$0xff]   ;;  %v2581_v48 = vld [vmem:[%s3341_s9 + $0x68] sm:$0xff]  }
 0x333   :  { %2060 = vmatmul.mubr.msk.bf16.vlgmr.msra.gmra.mrb[16].mxu1 %vm3144_vm5, %v2059_v16  ;;  %v2582_v16 = vld [vmem:[%s3341_s9 + $0xe8] sm:$0xff]  }
 0x334   :  { %2331 = vmatpush3.bf16.msra.mxu0 %v2535_v51  ;;  %1509 = vmatpush1.bf16.msra.mxu1 %v2537_v52  ;;  %v2583_v51 = vld [vmem:[%s3341_s9 + $0x28] sm:$0xff]   ;;  %v2588_v52 = vld [vmem:[%s3341_s9 + $0xb0] sm:$0xff]  }
 0x335   :  { %2332 = vmatprep.subr.bf16.mxu0 %v2596_v0  ;;  %v2542_v0 = vld [vmem:[%s3340_s7 + $0xc] ss:$16 sps:$4 sm:$0xff]   ;;  %1510 = vmatprep.subr.bf16.mxu1 %v2545_v63 }
 0x336   :  { %1540 = vmatprep.mubr.bf16.mxu1 %v2598_v34  ;;  %v2592_v63 = vld [vmem:[%s3341_s9 + $0xb8] sm:$0xff]  }
 0x338   :  { %2333 = vmatpush3.bf16.msra.mxu0 %v2536_v1  ;;  %1511 = vmatpush1.bf16.msra.mxu1 %v2543_v22  ;;  %v2585_v1 = vld [vmem:[%s3341_s9 + $0x70] sm:$0xff]  }
 0x339   :  { %1549 = vmatprep.subr.bf16.mxu0 %v2542_v0  ;;  %1512 = vmatprep.subr.bf16.mxu1 %v2551_v9  ;;  %v2591_v0 = vld [vmem:[%s3341_s9 + $0x38] sm:$0xff]  }
 0x33b   :  { %2335 = vmatmul.mubr.msk.bf16.vlgmr.msra.gmra.mrb[36].mxu0 %vm530_vm2, %v966_v20  ;;  %v2587_v20 = vld [vmem:[%s3341_s9 + $0x30] sm:$0xff]  }
 0x33c   :  { %1550 = vmatpush1.bf16.msra.mxu0 %v2540_v59  ;;  %1513 = vmatpush1.bf16.msra.mxu1 %v2549_v24  ;;  %v2590_v59 = vld [vmem:[%s3341_s9 + $0xf8] sm:$0xff]   ;;  %v1403_v24 = vld [vmem:[%s3343_s8] sm:$0xf] }
 0x33d   :  { %1551 = vmatprep.subr.bf16.mxu0 %v2548_v21  ;;  %1514 = vmatprep.subr.bf16.mxu1 %v2557_v28  ;;  %v1405_v21 = vlaneseq }
 0x33e   :  { %1581 = vmatprep.mubr.bf16.mxu0 %v2598_v34 }
 0x33f   :  { %v1406_v22 = vshrl.u32 %v1405_v21, 7 }
 0x340   :  { %1552 = vmatpush1.bf16.msra.mxu0 %v2546_v23  ;;  %1515 = vmatpush1.bf16.msra.mxu1 %v2555_v31 }
 0x341   :  { %1553 = vmatprep.subr.bf16.mxu0 %v2554_v26  ;;  %2282 = vmatprep.subr.bf16.mxu1 %v2561_v40  ;;  %v1407_v23 = vsub.s32 0, %v1406_v22  ;;  %v1415_v9 = vsub.s32 2, %v1406_v22  ;;  %v1411_v26 = vsub.s32 1, %v1406_v22 }
 0x343   :  { %v1408_v28 = vrot.slane %v1403_v24, %v1407_v23  ;;  %v1412_v31 = vrot.slane %v1403_v24, %v1411_v26 }
 0x344   :  { %1554 = vmatpush1.bf16.msra.mxu0 %v2552_v27  ;;  %v1419_v27 = vsub.s32 3, %v1406_v22 }
 0x345   :  { %1555 = vmatprep.subr.bf16.mxu0 %v2560_v29  ;;  %v1416_v29 = vrot.slane %v1403_v24, %v1415_v9 }
 0x348   :  { %1556 = vmatpush1.bf16.msra.mxu0 %v2558_v33  ;;  %v1420_v33 = vrot.slane %v1403_v24, %v1419_v27 }
 0x349   :  { %2304 = vmatprep.subr.bf16.mxu0 %v2562_v41 }
 0x3fe   :  { %v2249_v47 = vpop.f32.mrb[32].mxu0 }
 0x3ff   :  { %v2250_v42 = vpop.f32.mrb[33].mxu0 }
 0x400   :  { %v2251_v39 = vadd.f32 %v2250_v42, %v2249_v47  ;;  %v2252_v43 = vpop.f32.mrb[34].mxu0 }
 0x401   :  { %v2253_v44 = vpop.f32.mrb[35].mxu0 }
 0x402   :  { %v1300_v45 = vadd.f32 %v2251_v39, %v2012_v32 }
 0x406   :  { %v2271_v36 = vpop.f32.mrb[16].mxu1 }
 0x407   :  { %v2272_v50 = vpop.f32.mrb[17].mxu1 }
 0x408   :  { %v2273_v17 = vadd.f32 %v2272_v50, %v2271_v36  ;;  %v2274_v46 = vpop.f32.mrb[18].mxu1 }
 0x409   :  { %v2275_v54 = vpop.f32.mrb[19].mxu1 }
 0x40a   :  { %v1340_v56 = vadd.f32 %v2273_v17, %v1300_v45 }
 0x40e   :  { %v1379_v58 = vpop.f32.mrb[36].mxu0 }
 0x40f   :  { %v1380_v61 = vadd.f32 %v1379_v58, %v1340_v56  ;;  %v2336_v62 = vpop.f32.mrb[37].mxu0 }
 0x410   :  { %v1382_v37 = vpop.f32.mrb[38].mxu0 }
 0x411   :  { %v1385_v6 = vmax.f32 %v1380_v61, 0.0  ;;  %v2337_v18 = vpop.f32.mrb[39].mxu0 }
 0x413   :  { %v1386_v60 = vpack.c.bf16 %v1385_v6, %v1385_v6 }
 0x415   :  { %2078 = vmatmul.mubr.msk.bf16.vlgmr.msra.gmra.mrb[20].mxu1 %vm530_vm2, %v1386_v60  ;;  %2079 = vmatmul.mubr.msk.bf16.vlgmr.msra.gmra.mrb[40].mxu0 %vm530_vm2, %v1386_v60 }
 0x416   :  { %2283 = vmatpush3.bf16.msra.mxu1 %v2563_v30  ;;  %2305 = vmatpush3.bf16.msra.mxu0 %v2564_v2  ;;  %v2080_v30 = vld [vmem:[%s3344_s10] ss:$0 sm:$0xff] }
 0x417   :  { %2284 = vmatprep.subr.bf16.mxu1 %v2565_v3  ;;  %2306 = vmatprep.subr.bf16.mxu0 %v2566_v5 }
 0x41a   :  { %2285 = vmatpush3.bf16.msra.mxu1 %v2567_v38  ;;  %2307 = vmatpush3.bf16.msra.mxu0 %v2568_v7 }
 0x41b   :  { %2286 = vmatprep.subr.bf16.mxu1 %v2569_v53  ;;  %2308 = vmatprep.subr.bf16.mxu0 %v2570_v8 }
 0x41e   :  { %2287 = vmatpush3.bf16.msra.mxu1 %v2571_v10  ;;  %2309 = vmatpush3.bf16.msra.mxu0 %v2572_v11 }
 0x41f   :  { %2288 = vmatprep.subr.bf16.mxu1 %v2573_v12  ;;  %2310 = vmatprep.subr.bf16.mxu0 %v2574_v35 }
 0x422   :  { %2289 = vmatpush3.bf16.msra.mxu1 %v2575_v55  ;;  %2311 = vmatpush3.bf16.msra.mxu0 %v2576_v57 }
 0x423   :  { %2290 = vmatprep.subr.bf16.mxu1 %v2577_v13  ;;  %2312 = vmatprep.subr.bf16.mxu0 %v2578_v49 }
 0x426   :  { %2291 = vmatpush3.bf16.msra.mxu1 %v2579_v14  ;;  %2313 = vmatpush3.bf16.msra.mxu0 %v2580_v4 }
 0x427   :  { %2292 = vmatprep.subr.bf16.mxu1 %v2581_v48  ;;  %2314 = vmatprep.subr.bf16.mxu0 %v2582_v16 }
 0x42a   :  { %2293 = vmatpush3.bf16.msra.mxu1 %v2583_v51  ;;  %2315 = vmatpush3.bf16.msra.mxu0 %v2584_v15 }
 0x42b   :  { %2294 = vmatprep.subr.bf16.mxu1 %v2585_v1  ;;  %2316 = vmatprep.subr.bf16.mxu0 %v2586_v19 }
 0x42e   :  { %2295 = vmatpush3.bf16.msra.mxu1 %v2587_v20  ;;  %2317 = vmatpush3.bf16.msra.mxu0 %v2588_v52 }
 0x42f   :  { %2296 = vmatprep.subr.bf16.mxu1 %v2589_v25  ;;  %2318 = vmatprep.subr.bf16.mxu0 %v2590_v59 }
 0x432   :  { %2297 = vmatpush3.bf16.msra.mxu1 %v2591_v0  ;;  %2319 = vmatpush3.bf16.msra.mxu0 %v2592_v63 }
 0x4e8   :  { %v1542_v34 = vpop.f32.mrb[20].mxu1  ;;  %v1583_v40 = vpop.f32.mrb[40].mxu0 }
 0x4e9   :  { %v1543_v41 = vadd.f32 %v1542_v34, %v1408_v28  ;;  %v1584_v47 = vadd.f32 %v1583_v40, %v1416_v29  ;;  %v1544_v42 = vpop.f32.mrb[21].mxu1  ;;  %v1585_v39 = vpop.f32.mrb[41].mxu0 }
 0x4ea   :  { %v1545_v43 = vadd.f32 %v1544_v42, %v1412_v31  ;;  %v1586_v44 = vadd.f32 %v1585_v39, %v1420_v33  ;;  %v1546_v32 = vpop.f32.mrb[22].mxu1  ;;  %v1587_v36 = vpop.f32.mrb[42].mxu0 }
 0x4eb   :  { %v1590_v50 = vmax.f32 %v1543_v41, 0.0  ;;  %v1592_v45 = vmax.f32 %v1584_v47, 0.0  ;;  %v1547_v17 = vpop.f32.mrb[23].mxu1  ;;  %v1588_v46 = vpop.f32.mrb[43].mxu0 }
 0x4ec   :  { %v1591_v54 = vmax.f32 %v1545_v43, 0.0  ;;  %v1593_v56 = vmax.f32 %v1586_v44, 0.0 }
 0x4ed   :  { %v1594_v62 = vpack.c.bf16 %v1590_v50, %v1590_v50  ;;  %v1596_v37 = vpack.c.bf16 %v1592_v45, %v1592_v45 }
 0x4ee   :  { %v1595_v58 = vpack.c.bf16 %v1591_v54, %v1591_v54  ;;  %v1597_v61 = vpack.c.bf16 %v1593_v56, %v1593_v56 }
 0x4f0   :  { %1893 = vmatprep.mubr.bf16.mxu1 %v1595_v58  ;;  %1933 = vmatprep.mubr.bf16.mxu0 %v1597_v61 }
 0x4f1   :  { %1894 = vmatmul.mubr.bf16.vlgmr.msra.gmra.mrb[24].mxu1 %v1594_v62  ;;  %1934 = vmatmul.mubr.bf16.vlgmr.msra.gmra.mrb[44].mxu0 %v1596_v37 }
 0x5c4   :  { %v2298_v6 = vpop.f32.mrb[24].mxu1  ;;  %v2320_v18 = vpop.f32.mrb[44].mxu0 }
 0x5c5   :  { %v2299_v2 = vpop.f32.mrb[25].mxu1  ;;  %v2321_v60 = vpop.f32.mrb[45].mxu0 }
 0x5c6   :  { %v2300_v3 = vadd.f32 %v2299_v2, %v2298_v6  ;;  %v2322_v5 = vadd.f32 %v2321_v60, %v2320_v18  ;;  %v2301_v38 = vpop.f32.mrb[26].mxu1  ;;  %v2323_v7 = vpop.f32.mrb[46].mxu0 }
 0x5c7   :  { %v2302_v53 = vpop.f32.mrb[27].mxu1  ;;  %v2324_v8 = vpop.f32.mrb[47].mxu0 }
 0x5c8   :  { %v1896_v10 = vadd.f32 %v2300_v3, %v2080_v30 }
 0x5ca   :  { %v1936_v11 = vadd.f32 %v2322_v5, %v1896_v10 }
 0x5cc   :  { %1941 = vst [vmem:[%s3345_s11] sm:$0xff] %v1936_v11 }

</bundles_post_ra>
